<compile_context>
chip_gen: v5e
topology: v5e:2x2
jax: 0.10.0
libtpu: 0.0.40
codegen_flags: <defaults>
</compile_context>

<pallas_src>
import functools

import jax
import jax.numpy as jnp
from jax import lax
from jax.experimental import pallas as pl
from jax.experimental.pallas import tpu as pltpu

EPS = 1e-5


def _make_kernel(l_true, l_pad):
    """Build the LayerNorm kernel body (l_true / l_pad are trace-time consts)."""
    need_mask = l_pad != l_true
    inv_n = 1.0 / float(l_true)

    def kernel(x_ref, g_ref, b_ref, o_ref):
        # x_ref: (TB, TD, Lp)   g_ref / b_ref: (TD, 1)   o_ref: (TB, TD, Lp)
        x = x_ref[...].astype(jnp.float32)

        if need_mask:
            lane = lax.broadcasted_iota(jnp.int32, x.shape, x.ndim - 1)
            mask = (lane < l_true).astype(jnp.float32)
            mean = jnp.sum(x * mask, axis=-1, keepdims=True) * inv_n
            xc = (x - mean) * mask                       # two-pass, masked
        else:
            mean = jnp.sum(x, axis=-1, keepdims=True) * inv_n
            xc = x - mean                                # two-pass variance

        var = jnp.sum(xc * xc, axis=-1, keepdims=True) * inv_n

        # rsqrt once per row (EUP slot); fold gamma/beta into per-row
        # scale/shift so the per-element path is a single fused mul+add.
        inv = lax.rsqrt(var + EPS)                       # (TB, TD, 1)
        g = g_ref[...].astype(jnp.float32)[None, :, :]   # (1, TD, 1)
        b = b_ref[...].astype(jnp.float32)[None, :, :]   # (1, TD, 1)
        scale = g * inv                                  # (TB, TD, 1)
        shift = b - mean * scale                         # (TB, TD, 1)

        o_ref[...] = (x * scale + shift).astype(o_ref.dtype)

    return kernel


def _vmem_capacity_bytes():
    """Per-core VMEM capacity; conservative (v7x = 64 MiB) fallback."""
    try:
        info = pltpu.get_tpu_info()
        cap = getattr(info, "vmem_capacity_bytes", None)
        if cap:
            return int(cap)
    except Exception:
        pass
    return 64 << 20


def _choose_tiles(B, D, l_pad, itemsize, max_block_bytes, sub):
    """Pick (tb, td) so one (tb, td, l_pad) block is as big as the budget
    allows (target 4-8 MiB), obeys (sublane,128) tiling, and leaves >=2
    parallel grid steps for v7x's two TensorCores. No divisibility required:
    grids use cdiv and ragged edges are padded."""
    max_elems = max(1, max_block_bytes // itemsize)
    row = l_pad  # elements in one (1, 1, l_pad) row

    if D * row <= max_elems:
        td = D                                   # full D fits in one block
    else:
        td = (max_elems // row) // sub * sub     # largest sublane multiple
        td = max(td, min(D, sub))
        td = min(td, D)
    nd = pl.cdiv(D, td)

    max_tb = max(1, max_elems // (td * row))
    if nd >= 2 or B < 2:
        tb = max(1, min(B, max_tb))
    else:
        # Force >=2 steps along B so both v7x TensorCores get work.
        tb = max(1, min((B + 1) // 2, max_tb))
    nb = pl.cdiv(B, tb)
    return tb, td, nb, nd


def layer_norm(x, gamma, beta):
    """x: (B, D, L); gamma/beta: (D, 1). Matches the PyTorch module forward."""
    B, D, L = x.shape
    itemsize = jnp.dtype(x.dtype).itemsize

    # Pad L to a lane-dense multiple of 128 (unmasked stores); statistics in
    # the kernel are masked to the true L, and the output is sliced back.
    l_pad = max(128, ((L + 127) // 128) * 128)
    if l_pad != L:
        x = jnp.pad(x, ((0, 0), (0, 0), (0, l_pad - L)))

    # Sublane packing: 8 for 32-bit, 16 for 16-bit, 32 for 8-bit dtypes.
    sub = {4: 8, 2: 16, 1: 32}.get(itemsize, 8)

    # Generation-aware VMEM budget: in + out double-buffered (4x block) plus
    # ~2 f32 compute temps per block (upcast + centered copy).
    vmem_limit = int(_vmem_capacity_bytes() * 0.7)
    usable = int(vmem_limit * 0.8)
    denom = 4 + 2 * (4 // itemsize) if itemsize <= 4 else 6
    max_block_bytes = max(128 * 1024, min(8 << 20, usable // denom))

    tb, td, nb, nd = _choose_tiles(B, D, l_pad, itemsize, max_block_bytes, sub)
    grid = (nd, nb)  # D-tiles outer, B-tiles inner -> gamma/beta block index
    #                  is constant along the inner axis (no re-DMA per step).

    kernel = _make_kernel(L, l_pad)

    cost = pl.CostEstimate(
        flops=8 * B * D * L,
        transcendentals=B * D,
        bytes_accessed=2 * B * D * l_pad * itemsize + 2 * D * gamma.dtype.itemsize,
    )

    out = pl.pallas_call(
        kernel,
        out_shape=jax.ShapeDtypeStruct((B, D, l_pad), x.dtype),
        grid_spec=pltpu.PrefetchScalarGridSpec(
            num_scalar_prefetch=0,
            grid=grid,
            in_specs=[
                pl.BlockSpec((tb, td, l_pad), lambda di, bi: (bi, di, 0)),
                pl.BlockSpec((td, 1), lambda di, bi: (di, 0)),
                pl.BlockSpec((td, 1), lambda di, bi: (di, 0)),
            ],
            out_specs=pl.BlockSpec((tb, td, l_pad), lambda di, bi: (bi, di, 0)),
        ),
        compiler_params=pltpu.CompilerParams(
            dimension_semantics=("parallel", "parallel"),
            vmem_limit_bytes=vmem_limit,
        ),
        cost_estimate=cost,
    )(x, gamma, beta)

    if l_pad != L:
        out = out[:, :, :L]
    return out


if __name__ == "__main__":
    # Small demo shapes consistent with the module: batch=2, dimension=32,
    # normalized axis = 128.  The tiler keeps >=2 grid steps along B so both
    # TensorCores on v7x get work (grid = (1, 2) here).
    B, D, L = 2, 32, 128

    key = jax.random.PRNGKey(0)
    x = jax.random.normal(key, (B, D, L), dtype=jnp.float32)

    # Matches nn.Parameter(torch.ones(dimension, 1)) / torch.zeros(dimension, 1).
    gamma = jnp.ones((D, 1), dtype=jnp.float32)
    beta = jnp.zeros((D, 1), dtype=jnp.float32)

    out = layer_norm(x, gamma, beta)
    out = jax.block_until_ready(out)

    # Reference check: same math as the PyTorch forward (two-pass variance).
    mean = jnp.mean(x, axis=-1, keepdims=True)
    var = jnp.mean((x - mean) ** 2, axis=-1, keepdims=True)
    ref = gamma * ((x - mean) / jnp.sqrt(var + EPS)) + beta
    assert jnp.allclose(out, ref, atol=1e-4, rtol=1e-4), (
        float(jnp.max(jnp.abs(out - ref)))
    )

    print("KERNEL_OK")
</pallas_src>

<mosaic_0001>
module attributes {stable_mosaic.version = 11 : i64} {
  func.func @kernel(%arg0: i32, %arg1: i32, %arg2: memref<1x32x128xf32, #tpu.memory_space<vmem>>, %arg3: memref<32x1xf32, #tpu.memory_space<vmem>>, %arg4: memref<32x1xf32, #tpu.memory_space<vmem>>, %arg5: memref<1x32x128xf32, #tpu.memory_space<vmem>>) attributes {dimension_semantics = [#tpu.dimension_semantics<parallel>, #tpu.dimension_semantics<parallel>], iteration_bounds = array<i64: 1, 2>, scalar_prefetch = 0 : i64, scratch_operands = 0 : i64, tpu.core_type = #tpu.core_type<tc>, window_params = [{transform_indices = @transform_0, window_bounds = array<i64: 1, 32, 128>}, {transform_indices = @transform_1, window_bounds = array<i64: 32, 1>}, {transform_indices = @transform_2, window_bounds = array<i64: 32, 1>}, {transform_indices = @transform_3, window_bounds = array<i64: 1, 32, 128>}]} {
    %c0 = arith.constant 0 : index
    %c0_0 = arith.constant 0 : index
    %c0_1 = arith.constant 0 : index
    %0 = vector.load %arg2[%c0, %c0_0, %c0_1] : memref<1x32x128xf32, #tpu.memory_space<vmem>>, vector<1x32x128xf32>
    %cst = arith.constant dense<0.000000e+00> : vector<1x32xf32>
    %1 = vector.multi_reduction <add>, %0, %cst [2] : vector<1x32x128xf32> to vector<1x32xf32>
    %2 = vector.shape_cast %1 : vector<1x32xf32> to vector<1x32x1xf32>
    %cst_2 = arith.constant 7.812500e-03 : f32
    %3 = vector.broadcast %cst_2 : f32 to vector<1x32x1xf32>
    %4 = arith.mulf %2, %3 : vector<1x32x1xf32>
    %5 = vector.broadcast %4 : vector<1x32x1xf32> to vector<1x32x128xf32>
    %6 = arith.subf %0, %5 : vector<1x32x128xf32>
    %7 = arith.mulf %6, %6 : vector<1x32x128xf32>
    %cst_3 = arith.constant dense<0.000000e+00> : vector<1x32xf32>
    %8 = vector.multi_reduction <add>, %7, %cst_3 [2] : vector<1x32x128xf32> to vector<1x32xf32>
    %9 = vector.shape_cast %8 : vector<1x32xf32> to vector<1x32x1xf32>
    %cst_4 = arith.constant 7.812500e-03 : f32
    %10 = vector.broadcast %cst_4 : f32 to vector<1x32x1xf32>
    %11 = arith.mulf %9, %10 : vector<1x32x1xf32>
    %cst_5 = arith.constant 9.99999974E-6 : f32
    %12 = vector.broadcast %cst_5 : f32 to vector<1x32x1xf32>
    %13 = arith.addf %11, %12 : vector<1x32x1xf32>
    %14 = math.rsqrt %13 : vector<1x32x1xf32>
    %c0_6 = arith.constant 0 : index
    %c0_7 = arith.constant 0 : index
    %15 = vector.load %arg3[%c0_6, %c0_7] : memref<32x1xf32, #tpu.memory_space<vmem>>, vector<32x1xf32>
    %16 = vector.shape_cast %15 : vector<32x1xf32> to vector<1x32x1xf32>
    %c0_8 = arith.constant 0 : index
    %c0_9 = arith.constant 0 : index
    %17 = vector.load %arg4[%c0_8, %c0_9] : memref<32x1xf32, #tpu.memory_space<vmem>>, vector<32x1xf32>
    %18 = vector.shape_cast %17 : vector<32x1xf32> to vector<1x32x1xf32>
    %19 = arith.mulf %16, %14 : vector<1x32x1xf32>
    %20 = arith.mulf %4, %19 : vector<1x32x1xf32>
    %21 = arith.subf %18, %20 : vector<1x32x1xf32>
    %22 = vector.broadcast %19 : vector<1x32x1xf32> to vector<1x32x128xf32>
    %23 = arith.mulf %0, %22 : vector<1x32x128xf32>
    %24 = vector.broadcast %21 : vector<1x32x1xf32> to vector<1x32x128xf32>
    %25 = arith.addf %23, %24 : vector<1x32x128xf32>
    %c0_10 = arith.constant 0 : index
    %c0_11 = arith.constant 0 : index
    %c0_12 = arith.constant 0 : index
    %26 = vector.load %arg5[%c0_10, %c0_11, %c0_12] : memref<1x32x128xf32, #tpu.memory_space<vmem>>, vector<1x32x128xf32>
    tpu.vector_store %arg5[%c0_10, %c0_11, %c0_12], %25 {strides = array<i32>} : memref<1x32x128xf32, #tpu.memory_space<vmem>>, vector<1x32x128xf32>,
    return
  }
  func.func @transform_0(%arg0: i32, %arg1: i32) -> (i32, i32, i32) {
    %c0_i32 = arith.constant 0 : i32
    %c0_i32_0 = arith.constant 0 : i32
    return %arg1, %arg0, %c0_i32 : i32, i32, i32
  }
  func.func @transform_1(%arg0: i32, %arg1: i32) -> (i32, i32) {
    %c0_i32 = arith.constant 0 : i32
    %c0_i32_0 = arith.constant 0 : i32
    return %arg0, %c0_i32 : i32, i32
  }
  func.func @transform_2(%arg0: i32, %arg1: i32) -> (i32, i32) {
    %c0_i32 = arith.constant 0 : i32
    %c0_i32_0 = arith.constant 0 : i32
    return %arg0, %c0_i32 : i32, i32
  }
  func.func @transform_3(%arg0: i32, %arg1: i32) -> (i32, i32, i32) {
    %c0_i32 = arith.constant 0 : i32
    %c0_i32_0 = arith.constant 0 : i32
    return %arg1, %arg0, %c0_i32 : i32, i32, i32
  }
}

</mosaic_0001>

<bundles_post_ra>
// kernel: tpu_custom_call.1
= control target key start
LH: loop header
LB: loop body
LE: loop exit
PB: predicated region body
PF: predicated region fallthrough
CT: control target
= control target key end

     0   :  { %8 = vsyncpa [#allocation3], 0  ;;  %s869_s0 = inlined_call_operand.vmem [shape: f32[2,32,128], index: 0, kind: input, shape index: {}]   ;;  %s870_s1 = inlined_call_operand.vmem [shape: f32[32,1], index: 1, kind: input, shape index: {}]   ;;  %s871_s2 = inlined_call_operand.vmem [shape: f32[32,1], index: 2, kind: input, shape index: {}]   ;;  %s872_s3 = inlined_call_operand.hbm [shape: f32[2,32,128], index: 3, kind: output, shape index: {}]  }
   0x1   :  { %10 = vsyncpa [#allocation3 + $0x1], 0  ;;  %s712_s12 = smov 0   ;;  %s714_s13 = smov 0  }
   0x2   :  { %s716_s14 = smov 0   ;;  %s718_s15 = smov 0  }
   0x3   :  { %s720_s16 = smov 0   ;;  %s722_s17 = smov 0  }
   0x4 LB: > { %s523_s18 = sadd.s32 4294967295, %s687_s17   ;;  %s524_s19 = sadd.s32 4294967294, %s687_s17   ;;  %s687_s17 = sphi %s722_s17, %s16_s17   ;;  %s683_s16 = sphi %s720_s16, %s879_s16   ;;  %s679_s15 = sphi %s718_s15, %s878_s15   ;;  %s675_s14 = sphi %s716_s14, %s877_s14   ;;  %s671_s13 = sphi %s714_s13, %s876_s13   ;;  %s667_s12 = sphi %s712_s12, %s875_s12  }
   0x5   : > { %s25_s20 = sadd.s32 1, %s683_s16  ;;  %s117_s21 = sadd.s32 1, %s675_s14 }
   0x6   : > { %p26_p0 = scmp.ge.s32.totalorder %s25_s20, 2  ;;  %p127_p1 = scmp.ne.s32.totalorder %s675_s14, %s671_s13 }
   0x7   : > { %p128_p2 = scmp.eq.s32.totalorder %s523_s18, 1  ;;  %p133_p3 = scmp.ne.s32.totalorder %s671_s13, %s667_s12 }
   0x8   : > { %s881_s20 = smov (%p26_p0, %s25_s20), 0  ;;  %p134_p5 = scmp.eq.s32.totalorder %s524_s19, 1 }
   0x9   : > { %p752_p4 = por %p128_p2, %p127_p1  ;;  %s112_s23 = ssub.s32 %s683_s16, %s881_s20 }
   0xa   : > { %p529_p6 = scmp.ge.s32.totalorder %s687_s17, 1  ;;  %p115_p7 = scmp.eq.s32.totalorder %s112_s23, 0 }
   0xb   : > { %p759_p8 = por %p134_p5, %p133_p3  ;;  %p183_p9 = scmp.lt.s32.totalorder %s687_s17, 3 }
   0xc   : > { %s765_s25 = scalar_select %p115_p7, %s675_s14, %s117_s21  }
   0xd   : > { %p184_p10 = pnand %p529_p6, %p183_p9 }
   0xe   : > { %p222_p11 = scmp.lt.s32.totalorder (!%p184_p10), %s679_s15, 1  ;;  %s539_s6 = sshll.u32 (!%p184_p10), %s679_s15, 5 }
   0xf   : > { %187 = sbr.rel (%p184_p10) target bundleno = 429 (0x1ad), region = 32  ;;  %s410_s9 = scalar_lea.hbm (!%p184_p10), %s872_s3, %s539_s6 }
  0x10   : > { %s413_s11 = sshll.u32 (!%p184_p10), %s410_s9, 4  ;;  %s414_s11 = int_to_ptr.hbm [resolvable:$true] %s413_s11 }
  0x11   : > { %s623_s19 = sshra.s32 (!%p184_p10), %s414_s11, 4  ;;  %s624_s19 = int_to_ptr.hbm [resolvable:$true] %s623_s19 }
  0x12   : > { %p630_p1 = scmp.lt.s32.totalorder (!%p184_p10), %s624_s19, %s872_s3 }
  0x14   : > { %s223_s26 = scalar_select %p222_p11, %s679_s15, 1  ;;  %v689_v20 = vmov 0   ;;  %v324_v47 = vld [vmem:[%s870_s1] sm:$0xff]  ;;  %v326_v50 = vld [vmem:[%s870_s1 + $0x10] sm:$0xff]  ;;  %v327_v62 = vld [vmem:[%s870_s1 + $0x18] sm:$0xff] }
  0x15   : > { %600 = vset.pattern.permute.xlu1 %v689_v20  ;;  %598 = vset.pattern.permute.xlu2 %v689_v20  ;;  %s625_s15 = scalar_lea.hbm %s624_s19, 32 }
  0x16   : > { %s538_s27 = sshll.u32 %s223_s26, 5  ;;  %599 = vset.pattern.permute.xlu0 %v689_v20  ;;  %v331_v20 = vld [vmem:[%s871_s2 + $0x18] sm:$0xff]  ;;  %p626_p12 = scmp.ne.s32.totalorder %s624_s19, %s625_s15 }
  0x17   : > { %s229_s30 = scalar_lea.vmem %s869_s0, %s538_s27  ;;  %s629_s26 = scalar_lea.hbm %s872_s3, 64 }
  0x18   : > { %v772_v0 = vld [vmem:[%s229_s30 + $0x10] sm:$0xff]  ;;  %v774_v1 = vld [vmem:[%s229_s30] sm:$0xff]  ;;  %v778_v2 = vld [vmem:[%s229_s30 + $0x18] sm:$0xff]  ;;  %p627_p13 = pnand %p626_p12, %p752_p4  ;;  %p631_p2 = scmp.lt.s32.totalorder %s629_s26, %s625_s15 }
  0x19   : > { %252 = vadd.xlane.f32.xlu1 %v772_v0  ;;  %248 = vadd.xlane.f32.xlu0 %v774_v1  ;;  %v780_v3 = vld [vmem:[%s229_s30 + $0x8] sm:$0xff]  ;;  %s218_s30 = sand.u32 1, %s671_s13  }
  0x1a   : > { %s530_s4 = sshll.u32 %s218_s30, 5  ;;  %s397_s18 = scalar_lea.sflag [#allocation3], %s218_s30 }
  0x1b   : > { %s220_s5 = scalar_lea.vmem [#allocation2], %s530_s4  ;;  %p628_p0 = pneg %p627_p13 }
  0x1c   : > { %s411_s10 = sshll.u32 %s220_s5, 4  ;;  %p632_p3 = por %p631_p2, %p630_p1  ;;  %s412_s10 = int_to_ptr.vmem [resolvable:$true] %s411_s10 }
  0x1e   : > { %p633_p5 = pnand %p632_p3, %p628_p0 }
  0x21   : > { %254 = vadd.xlane.f32.xlu1 %v778_v2  ;;  %250 = vadd.xlane.f32.xlu0 %v780_v3 }
  0x8c   : > { %v253_v4 = vpop.xlane.xlu1 %252  ;;  %v249_v5 = vpop.xlane.xlu0 %248 }
  0x8d   : > { %v784_v6 = vmul.f32 0.0078125, %v253_v4  ;;  %v786_v7 = vmul.f32 0.0078125, %v249_v5  ;;  %v325_v4 = vld [vmem:[%s870_s1 + $0x8] sm:$0xff] }
  0x8f   : > { %v262_v8 = vsub.f32 %v772_v0, %v784_v6  ;;  %v260_v9 = vsub.f32 %v774_v1, %v786_v7 }
  0x91   : > { %v266_v10 = vmul.f32 %v262_v8, %v262_v8  ;;  %v264_v11 = vmul.f32 %v260_v9, %v260_v9 }
  0x93   : > { %272 = vadd.xlane.f32.xlu0 %v266_v10  ;;  %268 = vadd.xlane.f32.xlu2 %v264_v11  ;;  %v329_v11 = vld [vmem:[%s871_s2 + $0x8] sm:$0xff] }
  0x94   : > { %v255_v12 = vpop.xlane.xlu1 %254  ;;  %v251_v13 = vpop.xlane.xlu0 %250 }
  0x95   : > { %v792_v14 = vmul.f32 0.0078125, %v255_v12  ;;  %v794_v15 = vmul.f32 0.0078125, %v251_v13 }
  0x97   : > { %v263_v16 = vsub.f32 %v778_v2, %v792_v14  ;;  %v261_v17 = vsub.f32 %v780_v3, %v794_v15 }
  0x99   : > { %v267_v18 = vmul.f32 %v263_v16, %v263_v16  ;;  %v265_v19 = vmul.f32 %v261_v17, %v261_v17  ;;  %v328_v17 = vld [vmem:[%s871_s2] sm:$0xff] }
  0x9b   : > { %274 = vadd.xlane.f32.xlu1 %v267_v18  ;;  %270 = vadd.xlane.f32.xlu2 %v265_v19 }
 0x106   : > { %v269_v21 = vpop.xlane.xlu2 %268  ;;  %v273_v22 = vpop.xlane.xlu0 %272 }
 0x107   : > { %v276_v23 = vmul.f32 0.0078125, %v269_v21  ;;  %v278_v24 = vmul.f32 0.0078125, %v273_v22 }
 0x109   : > { %v280_v25 = vadd.f32 1e-05, %v276_v23  ;;  %v282_v26 = vadd.f32 1e-05, %v278_v24 }
 0x10b   : > { %601 = vrsqrt.f32 %v280_v25  ;;  %vm290_vm2 = vweird.f32 %v280_v25  ;;  %vm310_vm4 = vweird.f32 %v282_v26 }
 0x10c   : > { %603 = vrsqrt.f32 %v282_v26 }
 0x10e   : > { %v275_v27 = vpop.xlane.xlu1 %274  ;;  %v271_v28 = vpop.xlane.xlu2 %270 }
 0x10f   : > { %v279_v29 = vmul.f32 0.0078125, %v275_v27  ;;  %v277_v30 = vmul.f32 0.0078125, %v271_v28 }
 0x111   : > { %v602_v31 = vpop.eup %601  ;;  %v283_v32 = vadd.f32 1e-05, %v279_v29  ;;  %v281_v33 = vadd.f32 1e-05, %v277_v30 }
 0x112   : > { %v604_v34 = vpop.eup %603  ;;  %v285_v35 = vmul.f32 %v602_v31, %v280_v25  ;;  %vm291_vm0 = vweird.f32 %v602_v31 }
 0x113   : > { %v305_v36 = vmul.f32 %v604_v34, %v282_v26  ;;  %605 = vrsqrt.f32 %v283_v32  ;;  %vm311_vm1 = vweird.f32 %v604_v34  ;;  %vm292_vm3 = vmor %vm290_vm2, %vm291_vm0  ;;  %vm320_vm6 = vweird.f32 %v283_v32 }
 0x114   : > { %v286_v37 = vmul.f32 %v602_v31, %v285_v35  ;;  %607 = vrsqrt.f32 %v281_v33  ;;  %vm312_vm5 = vmor %vm310_vm4, %vm311_vm1  ;;  %vm300_vm10 = vweird.f32 %v281_v33 }
 0x115   : > { %v306_v38 = vmul.f32 %v604_v34, %v305_v36 }
 0x116   : > { %v287_v39 = vmul.f32 0.5, %v286_v37 }
 0x117   : > { %v307_v40 = vmul.f32 0.5, %v306_v38 }
 0x118   : > { %v288_v41 = vsub.f32 1.5, %v287_v39 }
 0x119   : > { %v606_v42 = vpop.eup %605  ;;  %v308_v43 = vsub.f32 1.5, %v307_v40 }
 0x11a   : > { %v608_v44 = vpop.eup %607  ;;  %v315_v45 = vmul.f32 %v606_v42, %v283_v32  ;;  %v289_v46 = vmul.f32 %v602_v31, %v288_v41  ;;  %vm321_vm7 = vweird.f32 %v606_v42 }
 0x11b   : > { %v295_v48 = vmul.f32 %v608_v44, %v281_v33  ;;  %v309_v49 = vmul.f32 %v604_v34, %v308_v43  ;;  %vm301_vm8 = vweird.f32 %v608_v44  ;;  %vm322_vm9 = vmor %vm320_vm6, %vm321_vm7 }
 0x11c   : > { %v316_v51 = vmul.f32 %v606_v42, %v315_v45  ;;  %v293_v52 = vsel %vm292_vm3, %v602_v31, %v289_v46  ;;  %vm302_vm11 = vmor %vm300_vm10, %vm301_vm8 }
 0x11d   : > { %v296_v53 = vmul.f32 %v608_v44, %v295_v48  ;;  %v332_v54 = vmul.f32 %v324_v47, %v293_v52  ;;  %v313_v55 = vsel %vm312_vm5, %v604_v34, %v309_v49 }
 0x11e   : > { %v317_v56 = vmul.f32 0.5, %v316_v51  ;;  %v334_v57 = vmul.f32 %v326_v50, %v313_v55 }
 0x11f   : > { %v297_v58 = vmul.f32 0.5, %v296_v53  ;;  %346 = vperm.xlu2 %598, %v332_v54   ;;  %v336_v13 = vmul.f32 %v332_v54, %v786_v7  ;;  %v330_v7 = vld [vmem:[%s871_s2 + $0x10] sm:$0xff] }
 0x120   : > { %v318_v59 = vsub.f32 1.5, %v317_v56  ;;  %356 = vperm.xlu1 %600, %v334_v57   ;;  %v338_v21 = vmul.f32 %v334_v57, %v784_v6 }
 0x121   : > { %v298_v60 = vsub.f32 1.5, %v297_v58  ;;  %v340_v18 = vsub.f32 %v328_v17, %v336_v13 }
 0x122   : > { %v319_v61 = vmul.f32 %v606_v42, %v318_v59  ;;  %v342_v22 = vsub.f32 %v330_v7, %v338_v21 }
 0x123   : > { %v299_v63 = vmul.f32 %v608_v44, %v298_v60 }
 0x124   : > { %v323_v5 = vsel %vm322_vm9, %v606_v42, %v319_v61 }
 0x125   : > { %v335_v8 = vmul.f32 %v327_v62, %v323_v5  ;;  %v303_v9 = vsel %vm302_vm11, %v608_v44, %v299_v63 }
 0x126   : > { %v333_v10 = vmul.f32 %v325_v4, %v303_v9 }
 0x127   : > { %361 = vperm.xlu2 %598, %v335_v8   ;;  %v339_v19 = vmul.f32 %v335_v8, %v792_v14 }
 0x128   : > { %351 = vperm.xlu0 %599, %v333_v10   ;;  %v337_v12 = vmul.f32 %v333_v10, %v794_v15 }
 0x129   : > { %v343_v15 = vsub.f32 %v331_v20, %v339_v19 }
 0x12a   : > { %v341_v16 = vsub.f32 %v329_v11, %v337_v12 }
 0x12c   : > { %375 = vperm.xlu1 %600, %v341_v16  }
 0x12f   : > { %370 = vperm.xlu2 %598, %v340_v18  }
 0x134   : > { %385 = vperm.xlu1 %600, %v343_v15  }
 0x137   : > { %380 = vperm.xlu2 %598, %v342_v22  }
 0x179   : > { %v347_v23 = vpop.permute.xlu2 %346 }
 0x17a   : > { %v364_v14 = vmul.f32 %v347_v23, %v774_v1 }
 0x181   : > { %v362_v24 = vpop.permute.xlu2 %361 }
 0x182   : > { %v367_v1 = vmul.f32 %v362_v24, %v778_v2 }
 0x189   : > { %v371_v25 = vpop.permute.xlu2 %370 }
 0x18a   : > { %v388_v26 = vadd.f32 %v371_v25, %v364_v14 }
 0x18c   : > { %392 = vst [vmem:[%s220_s5] sm:$0xff] %v388_v26 }
 0x191   : > { %v381_v28 = vpop.permute.xlu2 %380 }
 0x192   : > { %v357_v6 = vpop.permute.xlu1 %356 }
 0x193   : > { %v366_v27 = vmul.f32 %v357_v6, %v772_v0 }
 0x195   : > { %v390_v29 = vadd.f32 %v381_v28, %v366_v27 }
 0x197   : > { %394 = vst [vmem:[%s220_s5 + $0x10] sm:$0xff] %v390_v29 }
 0x19a   : > { %v352_v30 = vpop.permute.xlu0 %351 }
 0x19b   : > { %v365_v31 = vmul.f32 %v352_v30, %v780_v3 }
 0x19e   : > { %v376_v32 = vpop.permute.xlu1 %375 }
 0x19f   : > { %v389_v33 = vadd.f32 %v376_v32, %v365_v31 }
 0x1a1   : > { %393 = vst [vmem:[%s220_s5 + $0x8] sm:$0xff] %v389_v33 }
 0x1a6   : > { %v386_v0 = vpop.permute.xlu1 %385 }
 0x1a7   : > { %v391_v34 = vadd.f32 %v386_v0, %v367_v1 }
 0x1a9   : > { %395 = vst [vmem:[%s220_s5 + $0x18] sm:$0xff] %v391_v34 }
 0x1aa   : > { %636 = shalt.err (!%p633_p5)
}
 0x1ab   : > { %s690_s29 = smov 128   ;;  %s691_s30 = smov 8  }
 0x1ac   : > { %540 = dma.vmem_to_hbm [thread:$0]  (%p752_p4), %s412_s10, 512, %s414_s11, %s397_s18, %s690_s29, %s690_s29, %s691_s30  }
 0x1ad PF: > { %p546_p6 = scmp.ge.s32.totalorder %s687_s17, 2  ;;  %s428_s4 = sand.u32 1, %s667_s12  }
 0x1ae   : > { %s429_s5 = scalar_lea.sflag [#allocation3], %s428_s4 }
 0x1af   : > { %p543_p7 = pnand %p546_p6, %p759_p8 }
 0x1b1   : > { %p544_p9 = pneg %p543_p7 }
 0x1b3   : > { %662 = dma.done.wait (%p544_p9), %s429_s5, 512  }
 0x1b4   : > { %664 = vsyncadd (%p544_p9), %s429_s5, 4294966784  ;;  %s16_s17 = sadd.s32 1, %s687_s17   ;;  %s875_s12 = smov %s671_s13 }
 0x1b5   : > { %p13_p10 = scmp.ge.s32.totalorder %s16_s17, 4   ;;  %s876_s13 = smov %s675_s14 }
 0x1b6   : > { %s877_s14 = smov %s765_s25  ;;  %s878_s15 = smov %s683_s16 }
 0x1b7   : > { %s879_s16 = smov %s881_s20  ;;  %15 = sbr.rel (!%p13_p10) target bundleno = 4 (0x4), region = 73 }
 0x1bc   :  { %435 = vsyncpa [#allocation3], 1 }
 0x1bd   :  { %437 = vsyncpa [#allocation3 + $0x1], 1 }

</bundles_post_ra>
